<compile_context>
chip_gen: v7x
topology: tpu7x:2x2x1
jax: 0.10.0
libtpu: 0.0.40
codegen_flags: <defaults>
</compile_context>

<pallas_src>
import jax
import jax.numpy as jnp
from jax.experimental import pallas as pl
from jax.experimental.pallas import tpu as pltpu


def hybrid_kernel(w_ref, x_ref, o_ref):
    """w_ref: SMEM (R,) f32
       x_ref: VMEM (n_items*R, u_tile) f32  -- natural layout (item-major, rec-minor)
       o_ref: VMEM (n_items, u_tile) f32    -- doubles as the accumulator
    """
    n_items = o_ref.shape[0]
    n_rec = x_ref.shape[0] // n_items

    # layer_1 per (item, user): s[i, u] = sum_r w[r] * x[i*R + r, u].
    # Recommender r's rows sit at sublane offsets r, r+R, r+2R, ... -> strided
    # sublane loads directly from the natural layout (no HBM transpose pass).
    o_ref[...] = w_ref[0] * x_ref[pl.ds(0, n_items, stride=n_rec), :]
    for r in range(1, n_rec):
        o_ref[...] += w_ref[r] * x_ref[pl.ds(r, n_items, stride=n_rec), :]

    # Per-user normalization: divide each column by its max over all items
    # (matches torch.div(col, col.max()); an all-zero column yields inf/nan,
    # exactly as in PyTorch).
    col_max = jnp.max(o_ref[...], axis=0, keepdims=True)          # (1, u_tile)
    o_ref[...] = o_ref[...] * pl.reciprocal(col_max)


def _vmem_capacity_bytes():
    """Per-TensorCore VMEM; conservative v7x default if the query fails."""
    default = 64 * 1024 * 1024
    try:
        info = pltpu.get_tpu_info()
    except Exception:
        return default
    for name in ("vmem_capacity_bytes", "vmem_size_bytes", "vmem_bytes"):
        cap = getattr(info, name, None)
        if cap:
            return int(cap)
    return default


def _pick_u_tile(n_items, n_rec, n_users, vmem_budget_bytes):
    """Pick the user-tile width (lanes)."""
    # Double-buffered f32 input block (I*R, u_tile) + double-buffered f32
    # output block (I, u_tile).  The output block is the accumulator, so no
    # extra slab to budget.
    bytes_per_lane = 4 * n_items * (n_rec + 1) * 2
    max_lanes = vmem_budget_bytes // bytes_per_lane

    n_lane_blocks = -(-n_users // 128)                  # ceil(n_users / 128)
    if n_lane_blocks <= 1:
        # Single small tile: block last dim == full array dim, so the (8,128)
        # constraint does not apply and no padding is needed.
        assert max_lanes >= n_users, (
            "n_items too large for a single-pass per-user max at this width; "
            "TODO(synk): two-pass item-split normalization path not implemented")
        return n_users

    max_blocks = max_lanes // 128
    assert max_blocks >= 1, (
        "n_items too large for a single-pass per-user max even at u_tile=128; "
        "TODO(synk): two-pass item-split normalization path not implemented")

    # v7x megacore: keep >= 2 user tiles so dimension_semantics=('parallel',)
    # can shard them across both TensorCores (harmless on 1-TC v5e/v6e).
    blocks_per_tile = min(max_blocks, max(n_lane_blocks // 2, 1))
    # Derive the tile from the grid count so tiles are (near-)even -> no
    # mostly-wasted ragged grid step.
    n_tiles = -(-n_lane_blocks // blocks_per_tile)
    blocks_per_tile = -(-n_lane_blocks // n_tiles)
    return blocks_per_tile * 128


def hybridization_forward(x, weight, n_recommenders, *, u_tile=None):
    """x: (n_items*n_recommenders, n_users) f32; weight: (1, n_recommenders) f32."""
    x = jnp.asarray(x, jnp.float32)
    M, n_users = x.shape
    assert M % n_recommenders == 0
    n_items = M // n_recommenders

    w = jnp.asarray(weight, jnp.float32).reshape(n_recommenders)

    # Generation-aware VMEM budgeting: leave headroom for Mosaic internal
    # scratch (v7x: 64 MiB physical; v5e/v6e: 128 MiB -> bigger tiles).
    vmem_cap = _vmem_capacity_bytes()
    vmem_budget = max(vmem_cap - 24 * 1024 * 1024, 16 * 1024 * 1024)
    vmem_limit = max(vmem_cap - 16 * 1024 * 1024, 32 * 1024 * 1024)

    if u_tile is None:
        u_tile = _pick_u_tile(n_items, n_recommenders, n_users, vmem_budget)

    grid = (pl.cdiv(n_users, u_tile),)

    out = pl.pallas_call(
        hybrid_kernel,
        out_shape=jax.ShapeDtypeStruct((n_items, n_users), jnp.float32),
        grid=grid,
        in_specs=[
            pl.BlockSpec(memory_space=pltpu.MemorySpace.SMEM),          # weights
            pl.BlockSpec((M, u_tile), lambda u: (0, u)),                # x, natural layout
        ],
        out_specs=pl.BlockSpec((n_items, u_tile), lambda u: (0, u)),
        compiler_params=pltpu.CompilerParams(
            dimension_semantics=("parallel",),   # shards user tiles across TCs on v7x
            vmem_limit_bytes=vmem_limit,
        ),
    )(w, x)

    # TODO(synk): the PyTorch forward also prints layer_1.weight / bias; that
    # side-effect print is intentionally omitted.
    return out


def _reference(x, weight, n_recommenders):
    M, n_users = x.shape
    n_items = M // n_recommenders
    x3 = x.reshape(n_items, n_recommenders, n_users)
    s = jnp.sum(x3 * weight.reshape(1, n_recommenders, 1), axis=1)
    return s / jnp.max(s, axis=0, keepdims=True)


if __name__ == "__main__":
    key = jax.random.PRNGKey(0)

    # Small shapes consistent with the module's forward.
    n_recommenders = 4
    n_items = 16
    n_users = 8
    M = n_items * n_recommenders

    k1, k2 = jax.random.split(key)
    x = jax.random.uniform(k1, (M, n_users), dtype=jnp.float32)
    # layer_1.weight.data.fill_(1) -> (out_features=1, in_features=n_recommenders)
    weight = jnp.ones((1, n_recommenders), dtype=jnp.float32)

    out = jax.block_until_ready(hybridization_forward(x, weight, n_recommenders))
    ref = _reference(x, weight, n_recommenders)
    assert out.shape == (n_items, n_users)
    assert jnp.allclose(out, ref, rtol=1e-5, atol=1e-5)

    # Second small check exercising the multi-tile + ragged-last-tile path.
    n_users2 = 300
    x2 = jax.random.uniform(k2, (M, n_users2), dtype=jnp.float32)
    out2 = jax.block_until_ready(
        hybridization_forward(x2, weight, n_recommenders, u_tile=128))
    ref2 = _reference(x2, weight, n_recommenders)
    assert out2.shape == (n_items, n_users2)
    assert jnp.allclose(out2, ref2, rtol=1e-5, atol=1e-5)

    print("KERNEL_OK")
</pallas_src>

<mosaic_0001>
module attributes {stable_mosaic.version = 11 : i64} {
  func.func @hybrid_kernel(%arg0: i32, %arg1: memref<4xf32, #tpu.memory_space<smem>>, %arg2: memref<64x8xf32, #tpu.memory_space<vmem>>, %arg3: memref<16x8xf32, #tpu.memory_space<vmem>>) attributes {dimension_semantics = [#tpu.dimension_semantics<parallel>], iteration_bounds = array<i64: 1>, scalar_prefetch = 0 : i64, scratch_operands = 0 : i64, tpu.core_type = #tpu.core_type<tc>, window_params = [{transform_indices = @transform_0, window_bounds = array<i64: 4>}, {transform_indices = @transform_1, window_bounds = array<i64: 64, 8>}, {transform_indices = @transform_2, window_bounds = array<i64: 16, 8>}]} {
    %c0 = arith.constant 0 : index
    %0 = memref.load %arg1[%c0] : memref<4xf32, #tpu.memory_space<smem>>
    %c0_0 = arith.constant 0 : index
    %c0_1 = arith.constant 0 : index
    %1 = tpu.strided_load %arg2[%c0_0, %c0_1] {strides = array<i32: 4, 1>} : memref<64x8xf32, #tpu.memory_space<vmem>>, vector<16x8xf32>
    %2 = vector.broadcast %0 : f32 to vector<16x8xf32>
    %3 = arith.mulf %2, %1 : vector<16x8xf32>
    %c0_2 = arith.constant 0 : index
    %c0_3 = arith.constant 0 : index
    %4 = vector.load %arg3[%c0_2, %c0_3] : memref<16x8xf32, #tpu.memory_space<vmem>>, vector<16x8xf32>
    tpu.vector_store %arg3[%c0_2, %c0_3], %3 {strides = array<i32>} : memref<16x8xf32, #tpu.memory_space<vmem>>, vector<16x8xf32>,
    %c0_4 = arith.constant 0 : index
    %c0_5 = arith.constant 0 : index
    %5 = vector.load %arg3[%c0_4, %c0_5] : memref<16x8xf32, #tpu.memory_space<vmem>>, vector<16x8xf32>
    %c1 = arith.constant 1 : index
    %6 = memref.load %arg1[%c1] : memref<4xf32, #tpu.memory_space<smem>>
    %c1_6 = arith.constant 1 : index
    %c0_7 = arith.constant 0 : index
    %7 = tpu.strided_load %arg2[%c1_6, %c0_7] {strides = array<i32: 4, 1>} : memref<64x8xf32, #tpu.memory_space<vmem>>, vector<16x8xf32>
    %8 = vector.broadcast %6 : f32 to vector<16x8xf32>
    %9 = arith.mulf %8, %7 : vector<16x8xf32>
    %10 = arith.addf %5, %9 : vector<16x8xf32>
    %c0_8 = arith.constant 0 : index
    %c0_9 = arith.constant 0 : index
    %11 = vector.load %arg3[%c0_8, %c0_9] : memref<16x8xf32, #tpu.memory_space<vmem>>, vector<16x8xf32>
    tpu.vector_store %arg3[%c0_8, %c0_9], %10 {strides = array<i32>} : memref<16x8xf32, #tpu.memory_space<vmem>>, vector<16x8xf32>,
    %c0_10 = arith.constant 0 : index
    %c0_11 = arith.constant 0 : index
    %12 = vector.load %arg3[%c0_10, %c0_11] : memref<16x8xf32, #tpu.memory_space<vmem>>, vector<16x8xf32>
    %c2 = arith.constant 2 : index
    %13 = memref.load %arg1[%c2] : memref<4xf32, #tpu.memory_space<smem>>
    %c2_12 = arith.constant 2 : index
    %c0_13 = arith.constant 0 : index
    %14 = tpu.strided_load %arg2[%c2_12, %c0_13] {strides = array<i32: 4, 1>} : memref<64x8xf32, #tpu.memory_space<vmem>>, vector<16x8xf32>
    %15 = vector.broadcast %13 : f32 to vector<16x8xf32>
    %16 = arith.mulf %15, %14 : vector<16x8xf32>
    %17 = arith.addf %12, %16 : vector<16x8xf32>
    %c0_14 = arith.constant 0 : index
    %c0_15 = arith.constant 0 : index
    %18 = vector.load %arg3[%c0_14, %c0_15] : memref<16x8xf32, #tpu.memory_space<vmem>>, vector<16x8xf32>
    tpu.vector_store %arg3[%c0_14, %c0_15], %17 {strides = array<i32>} : memref<16x8xf32, #tpu.memory_space<vmem>>, vector<16x8xf32>,
    %c0_16 = arith.constant 0 : index
    %c0_17 = arith.constant 0 : index
    %19 = vector.load %arg3[%c0_16, %c0_17] : memref<16x8xf32, #tpu.memory_space<vmem>>, vector<16x8xf32>
    %c3 = arith.constant 3 : index
    %20 = memref.load %arg1[%c3] : memref<4xf32, #tpu.memory_space<smem>>
    %c3_18 = arith.constant 3 : index
    %c0_19 = arith.constant 0 : index
    %21 = tpu.strided_load %arg2[%c3_18, %c0_19] {strides = array<i32: 4, 1>} : memref<64x8xf32, #tpu.memory_space<vmem>>, vector<16x8xf32>
    %22 = vector.broadcast %20 : f32 to vector<16x8xf32>
    %23 = arith.mulf %22, %21 : vector<16x8xf32>
    %24 = arith.addf %19, %23 : vector<16x8xf32>
    %c0_20 = arith.constant 0 : index
    %c0_21 = arith.constant 0 : index
    %25 = vector.load %arg3[%c0_20, %c0_21] : memref<16x8xf32, #tpu.memory_space<vmem>>, vector<16x8xf32>
    tpu.vector_store %arg3[%c0_20, %c0_21], %24 {strides = array<i32>} : memref<16x8xf32, #tpu.memory_space<vmem>>, vector<16x8xf32>,
    %c0_22 = arith.constant 0 : index
    %c0_23 = arith.constant 0 : index
    %26 = vector.load %arg3[%c0_22, %c0_23] : memref<16x8xf32, #tpu.memory_space<vmem>>, vector<16x8xf32>
    %cst = arith.constant dense<0xFF800000> : vector<8xf32>
    %27 = vector.multi_reduction <maximumf>, %26, %cst [0] : vector<16x8xf32> to vector<8xf32>
    %28 = vector.shape_cast %27 : vector<8xf32> to vector<1x8xf32>
    %c0_24 = arith.constant 0 : index
    %c0_25 = arith.constant 0 : index
    %29 = vector.load %arg3[%c0_24, %c0_25] : memref<16x8xf32, #tpu.memory_space<vmem>>, vector<16x8xf32>
    %30 = tpu.reciprocal %28 : vector<1x8xf32> -> vector<1x8xf32>
    %31 = vector.broadcast %30 : vector<1x8xf32> to vector<16x8xf32>
    %32 = arith.mulf %29, %31 : vector<16x8xf32>
    %c0_26 = arith.constant 0 : index
    %c0_27 = arith.constant 0 : index
    %33 = vector.load %arg3[%c0_26, %c0_27] : memref<16x8xf32, #tpu.memory_space<vmem>>, vector<16x8xf32>
    tpu.vector_store %arg3[%c0_26, %c0_27], %32 {strides = array<i32>} : memref<16x8xf32, #tpu.memory_space<vmem>>, vector<16x8xf32>,
    return
  }
  func.func @transform_0(%arg0: i32) -> i32 {
    %c0_i32 = arith.constant 0 : i32
    %c0_i32_0 = arith.constant 0 : i32
    return %c0_i32 : i32
  }
  func.func @transform_1(%arg0: i32) -> (i32, i32) {
    %c0_i32 = arith.constant 0 : i32
    %c0_i32_0 = arith.constant 0 : i32
    return %c0_i32, %arg0 : i32, i32
  }
  func.func @transform_2(%arg0: i32) -> (i32, i32) {
    %c0_i32 = arith.constant 0 : i32
    %c0_i32_0 = arith.constant 0 : i32
    return %c0_i32, %arg0 : i32, i32
  }
}

</mosaic_0001>

<bundles_post_ra>
// kernel: tpu_custom_call.1
= control target key start
LH: loop header
LB: loop body
LE: loop exit
PB: predicated region body
PF: predicated region fallthrough
CT: control target
= control target key end

     0   :  { %7 = vsyncpa [#allocation3], 0  ;;  %s233_s0 = inlined_call_operand.vmem [shape: f32[4], index: 0, kind: input, shape index: {}]   ;;  %s234_s1 = inlined_call_operand.vmem [shape: f32[64,8], index: 1, kind: input, shape index: {}]   ;;  %s235_s2 = inlined_call_operand.vmem [shape: f32[16,8], index: 2, kind: output, shape index: {}]  }
   0x1   :  { %s14_s11 = sshll.u32 %s233_s0, 4  ;;  %s15_s11 = int_to_ptr.vmem [resolvable:$true] %s14_s11 }
   0x2   :  { %s110_s12 = scalar_lea.vmem %s15_s11, 16  ;;  %p115_p1 = scmp.lt.s32.totalorder %s15_s11, %s15_s11 }
   0x3   :  { %p111_p0 = scmp.ne.s32.totalorder %s15_s11, %s110_s12  ;;  %p116_p2 = scmp.lt.s32.totalorder %s110_s12, %s110_s12 }
   0x5   :  { %p117_p3 = por %p116_p2, %p115_p1 }
   0x7   :  { %p118_p4 = pnand %p117_p3, %p111_p0 }
   0x9   :  { %121 = shalt.err (!%p118_p4)
}
   0xa   :  { %s124_s13 = smov [#allocation2]  }
   0xb   :  { %17 = dma.vmem_to_smem %s15_s11, 16, %s124_s13, [#allocation3]  }
   0xc   :  { %122 = dma.done.wait [#allocation3], 16  }
   0xd   :  { %123 = vsyncadd [#allocation3], 4294967280 }
   0xe   :  { %23 = sfence }
   0xf   :  { %s24_s14 = sld [smem:[#allocation2]]  ;;  %s98_s15 = sld [smem:[#allocation2 + $0x1]]  ;;  %v25_v0 = vld [vmem:[%s234_s1] ss:$4 sm:$0xff]  ;;  %vm31_vm0 = vcmask 64512  }
  0x10   :  { %v97_v1 = vld [vmem:[%s234_s1 + $0x20] ss:$4 sm:$0xff]  ;;  %v99_v5 = vld [vmem:[%s234_s1 + $0x1] ss:$4 sm:$0xff]  ;;  %s101_s27 = sld [smem:[#allocation2 + $0x2]]  ;;  %s104_s12 = sld [smem:[#allocation2 + $0x3]] }
  0x11   :  { %v100_v7 = vld [vmem:[%s234_s1 + $0x21] ss:$4 sm:$0xff]  ;;  %v102_v14 = vld [vmem:[%s234_s1 + $0x2] ss:$4 sm:$0xff]  ;;  %v105_v23 = vld [vmem:[%s234_s1 + $0x3] ss:$4 sm:$0xff] }
  0x12   :  { %v103_v16 = vld [vmem:[%s234_s1 + $0x22] ss:$4 sm:$0xff]  ;;  %v106_v25 = vld [vmem:[%s234_s1 + $0x23] ss:$4 sm:$0xff] }
  0x15   :  { %v28_v2 = vstv %s24_s14  ;;  %v41_v6 = vstv %s98_s15 }
  0x16   :  { %v29_v3 = vmul.f32 %v28_v2, %v25_v0  ;;  %v30_v4 = vmul.f32 %v97_v1, %v28_v2  ;;  %v42_v8 = vmul.f32 %v99_v5, %v41_v6  ;;  %v43_v9 = vmul.f32 %v100_v7, %v41_v6 }
  0x17   :  { %v55_v15 = vstv %s101_s27  ;;  %v69_v24 = vstv %s104_s12 }
  0x18   :  { %32 = vst.msk [vmem:[%s235_s2] sm:$0xff] %vm31_vm0, %v29_v3  ;;  %33 = vst.msk [vmem:[%s235_s2 + $0x8] sm:$0xff] %vm31_vm0, %v30_v4  ;;  %v56_v17 = vmul.f32 %v102_v14, %v55_v15  ;;  %v57_v18 = vmul.f32 %v103_v16, %v55_v15  ;;  %v70_v26 = vmul.f32 %v105_v23, %v69_v24 }
  0x19   :  { %v71_v27 = vmul.f32 %v106_v25, %v69_v24 }
  0x1f   :  { %v34_v10 = vld [vmem:[%s235_s2] sm:$0xff]  ;;  %v35_v11 = vld [vmem:[%s235_s2 + $0x8] sm:$0xff] }
  0x20   :  { %v44_v12 = vadd.f32 %v42_v8, %v34_v10  ;;  %v45_v13 = vadd.f32 %v43_v9, %v35_v11 }
  0x22   :  { %46 = vst.msk [vmem:[%s235_s2] sm:$0xff] %vm31_vm0, %v44_v12  ;;  %47 = vst.msk [vmem:[%s235_s2 + $0x8] sm:$0xff] %vm31_vm0, %v45_v13 }
  0x29   :  { %v48_v19 = vld [vmem:[%s235_s2] sm:$0xff]  ;;  %v49_v20 = vld [vmem:[%s235_s2 + $0x8] sm:$0xff] }
  0x2a   :  { %v58_v21 = vadd.f32 %v56_v17, %v48_v19  ;;  %v59_v22 = vadd.f32 %v57_v18, %v49_v20 }
  0x2c   :  { %60 = vst.msk [vmem:[%s235_s2] sm:$0xff] %vm31_vm0, %v58_v21  ;;  %61 = vst.msk [vmem:[%s235_s2 + $0x8] sm:$0xff] %vm31_vm0, %v59_v22 }
  0x33   :  { %v62_v28 = vld [vmem:[%s235_s2] sm:$0xff]  ;;  %v63_v29 = vld [vmem:[%s235_s2 + $0x8] sm:$0xff] }
  0x34   :  { %v72_v30 = vadd.f32 %v70_v26, %v62_v28  ;;  %v73_v31 = vadd.f32 %v71_v27, %v63_v29 }
  0x36   :  { %74 = vst.msk [vmem:[%s235_s2] sm:$0xff] %vm31_vm0, %v72_v30  ;;  %75 = vst.msk [vmem:[%s235_s2 + $0x8] sm:$0xff] %vm31_vm0, %v73_v31 }
  0x3d   :  { %v76_v32 = vld [vmem:[%s235_s2] sm:$0xff]  ;;  %v77_v33 = vld [vmem:[%s235_s2 + $0x8] sm:$0xff] }
  0x3e   :  { %v78_v34 = vsel %vm31_vm0, %v76_v32, -inf  ;;  %v79_v35 = vsel %vm31_vm0, %v77_v33, -inf }
  0x3f   :  { %v80_v36 = vmax.f32 %v78_v34, %v79_v35 }
  0x41   :  { %v81_v37 = vrot.slane %v80_v36, 4 }
  0x43   :  { %v82_v38 = vmax.f32 %v80_v36, %v81_v37 }
  0x45   :  { %v83_v39 = vrot.slane %v82_v38, 2 }
  0x47   :  { %v84_v40 = vmax.f32 %v82_v38, %v83_v39 }
  0x49   :  { %v85_v41 = vrot.slane %v84_v40, 1 }
  0x4b   :  { %v86_v42 = vmax.f32 %v84_v40, %v85_v41 }
  0x4d   :  { %108 = vrcp.f32 %v86_v42 }
  0x57   :  { %v109_v43 = vpop.eup %108 }
  0x58   :  { %v88_v44 = vmul.f32 %v109_v43, %v76_v32  ;;  %v89_v45 = vmul.f32 %v109_v43, %v77_v33 }
  0x5a   :  { %90 = vst.msk [vmem:[%s235_s2] sm:$0xff] %vm31_vm0, %v88_v44  ;;  %91 = vst.msk [vmem:[%s235_s2 + $0x8] sm:$0xff] %vm31_vm0, %v89_v45 }
  0x5b   :  { %96 = vsyncpa [#allocation3], 1 }

</bundles_post_ra>
